<compile_context>
chip_gen: v5e
topology: v5e:2x2
jax: 0.10.0
libtpu: 0.0.40
codegen_flags: <defaults>
</compile_context>

<pallas_src>
import functools
import math

import jax
import jax.numpy as jnp
from jax.experimental import pallas as pl
from jax.experimental.pallas import tpu as pltpu

BN_EPS = 1e-5
LANE = 128            # channel padding target (TPU lane width)
SUBLANE = 8
MAX_TILE_T = 256      # output rows per tile; tune per generation (v5e/v6e can use 512-1024)
VMEM_LIMIT = 48 * 1024 * 1024


def _round_up(x, m):
    return ((x + m - 1) // m) * m


# --------------------------------------------------------------------------------------
# Pallas kernel: fused 1-D conv (kw taps accumulated in-kernel) + folded-BN bias
#                + (partial) ReLU + optional fused residual add.
# One grid cell = (batch b, output time tile t).
# --------------------------------------------------------------------------------------
def _conv_bn_kernel(*refs, kw, stride, c_in, relu_cols, has_res):
    n_x = 1 if stride == 1 else 2
    x_refs = refs[:n_x]                      # full padded time slab(s) for batch b
    w_ref = refs[n_x]                        # (kw*c_in, c_out), BN scale folded, bf16
    b_ref = refs[n_x + 1]                    # (1, c_out) f32
    if has_res:
        res_ref = refs[n_x + 2]              # (1, tile_t, c_out)
        o_ref = refs[n_x + 3]
    else:
        res_ref = None
        o_ref = refs[n_x + 2]

    tile_t = o_ref.shape[1]
    c_out = o_ref.shape[2]
    t0 = pl.multiple_of(pl.program_id(1) * tile_t, tile_t)

    acc = jnp.zeros((tile_t, c_out), jnp.float32)
    for k in range(kw):                      # static unroll (kw <= 9)
        if stride == 1:
            src, off = x_refs[0], k
        else:                                # stride 2: even/odd de-interleaved streams
            src, off = x_refs[k % 2], k // 2
        xk = src[0, pl.ds(t0 + off, tile_t), :]                 # (tile_t, c_in) bf16
        wk = w_ref[k * c_in:(k + 1) * c_in, :]                  # (c_in, c_out)  bf16
        acc = acc + jnp.dot(xk, wk, preferred_element_type=jnp.float32)

    y = acc + b_ref[...].astype(jnp.float32)
    if has_res:
        y = y + res_ref[0].astype(jnp.float32)
    if relu_cols >= c_out:                   # plain ReLU
        y = jnp.maximum(y, 0.0)
    elif relu_cols > 0:                      # ReLU only on the conv1 half (down fusion)
        col = jax.lax.broadcasted_iota(jnp.int32, (tile_t, c_out), 1)
        y = jnp.where(col < relu_cols, jnp.maximum(y, 0.0), y)
    o_ref[0] = y.astype(o_ref.dtype)


# --------------------------------------------------------------------------------------
# Wrapper: tiling / padding glue + pallas_call
# --------------------------------------------------------------------------------------
def conv1d_bn(x_btc, w, bias, *, kw, stride, relu_cols, residual=None):
    """x_btc: (B, T_in, Cin) bf16, channel-padded.  w: (kw*Cin, Cout) bf16 with BN scale
    folded in.  bias: (Cout,) f32.  Returns (B, T_out, Cout) bf16."""
    assert kw % 2 == 1, "only odd conv widths supported (pad == (kw - 1) // 2)"
    B, T_in, Cin = x_btc.shape
    Cout = w.shape[1]
    assert w.shape[0] == kw * Cin and Cin % LANE == 0 and Cout % LANE == 0

    pad = (kw - 1) // 2
    T_out = (T_in + 2 * pad - kw) // stride + 1
    tile_t = min(MAX_TILE_T, _round_up(T_out, SUBLANE))
    T_out_pad = _round_up(T_out, tile_t)
    n_t = T_out_pad // tile_t

    if stride == 1:
        t_slab = _round_up(T_out_pad + kw - 1, SUBLANE)
        x_slab = jnp.pad(x_btc, ((0, 0), (pad, t_slab - pad - T_in), (0, 0)))
        streams = (x_slab,)
    else:  # stride 2: de-interleave once (1x copy) instead of 9x im2col
        t_slab = _round_up(T_out_pad + (kw - 1) // 2, SUBLANE)
        x_full = jnp.pad(x_btc, ((0, 0), (pad, 2 * t_slab - pad - T_in), (0, 0)))
        streams = (x_full[:, 0::2, :], x_full[:, 1::2, :])

    args = list(streams) + [w, bias.reshape(1, Cout).astype(jnp.float32)]
    in_specs = (
        [pl.BlockSpec((1, t_slab, Cin), lambda b, t: (b, 0, 0)) for _ in streams]
        + [pl.BlockSpec((kw * Cin, Cout), lambda b, t: (0, 0)),
           pl.BlockSpec((1, Cout), lambda b, t: (0, 0))]
    )
    has_res = residual is not None
    if has_res:
        res = jnp.pad(residual, ((0, 0), (0, T_out_pad - residual.shape[1]), (0, 0)))
        args.append(res)
        in_specs.append(pl.BlockSpec((1, tile_t, Cout), lambda b, t: (b, t, 0)))

    kernel = functools.partial(_conv_bn_kernel, kw=kw, stride=stride, c_in=Cin,
                               relu_cols=relu_cols, has_res=has_res)
    flops = 2 * B * T_out_pad * (kw * Cin) * Cout
    bytes_accessed = int(sum(int(a.size) * a.dtype.itemsize for a in args)
                         + B * T_out_pad * Cout * 2)

    out = pl.pallas_call(
        kernel,
        out_shape=jax.ShapeDtypeStruct((B, T_out_pad, Cout), jnp.bfloat16),
        grid=(B, n_t),
        in_specs=in_specs,
        out_specs=pl.BlockSpec((1, tile_t, Cout), lambda b, t: (b, t, 0)),
        compiler_params=pltpu.CompilerParams(
            dimension_semantics=("parallel", "parallel"),
            vmem_limit_bytes=VMEM_LIMIT),
        cost_estimate=pl.CostEstimate(flops=flops, transcendentals=0,
                                      bytes_accessed=bytes_accessed),
    )(*args)
    return out[:, :T_out, :]


# --------------------------------------------------------------------------------------
# Parameters (mirrors ResDavenet.__init__ init scheme); BN scale folded into weights.
# --------------------------------------------------------------------------------------
def bn_fold(channels, gamma=None, beta=None, mean=None, var=None):
    gamma = jnp.ones((channels,), jnp.float32) if gamma is None else gamma
    beta = jnp.zeros((channels,), jnp.float32) if beta is None else beta
    mean = jnp.zeros((channels,), jnp.float32) if mean is None else mean
    var = jnp.ones((channels,), jnp.float32) if var is None else var
    scale = gamma / jnp.sqrt(var + BN_EPS)
    bias = beta - mean * scale
    return scale, bias


def init_params(key, feat_dim, layer_widths, layers, convsize):
    keys = iter(jax.random.split(key, 4 * sum(layers) + 4))
    params = {}

    C0 = layer_widths[0]
    Fp, C0p = _round_up(feat_dim, LANE), _round_up(C0, LANE)
    # stem conv1: torch weight (C0, 1, feat_dim, 1); n = feat_dim * 1 * C0
    std = math.sqrt(2.0 / (feat_dim * 1 * C0))
    w = std * jax.random.normal(next(keys), (feat_dim, C0), jnp.float32)
    s, b = bn_fold(C0)
    W = jnp.zeros((Fp, C0p), jnp.float32).at[:feat_dim, :C0].set(w * s[None, :])
    Bv = jnp.zeros((C0p,), jnp.float32).at[:C0].set(b)
    params["stem"] = {"w": W.astype(jnp.bfloat16), "b": Bv,
                      "cout": C0, "cout_pad": C0p, "feat": feat_dim, "feat_pad": Fp}

    blocks_all = []
    inplanes = C0
    for li in range(4):
        planes = layer_widths[li + 1]
        blocks = []
        for bi in range(layers[li]):
            stride = 2 if bi == 0 else 1
            has_down = (stride != 1) or (inplanes != planes)
            cin_p, cout_p = _round_up(inplanes, LANE), _round_up(planes, LANE)
            kw = convsize

            std1 = math.sqrt(2.0 / (1 * kw * planes))
            w1 = std1 * jax.random.normal(next(keys), (kw, inplanes, planes), jnp.float32)
            s1, b1 = bn_fold(planes)
            w1 = w1 * s1[None, None, :]

            std2 = math.sqrt(2.0 / (1 * kw * planes))
            w2 = std2 * jax.random.normal(next(keys), (kw, planes, planes), jnp.float32)
            s2, b2 = bn_fold(planes)
            w2 = w2 * s2[None, None, :]
            W2 = (jnp.zeros((kw, cout_p, cout_p), jnp.float32)
                  .at[:, :planes, :planes].set(w2)
                  .reshape(kw * cout_p, cout_p).astype(jnp.bfloat16))
            B2 = jnp.zeros((cout_p,), jnp.float32).at[:planes].set(b2)

            if has_down:
                # 1x1 downsample conv + BN fused into conv1 as extra output columns
                # that read only the centre tap (centre of kw == pad => x[stride*t]).
                stdd = math.sqrt(2.0 / (1 * 1 * planes))
                wd = stdd * jax.random.normal(next(keys), (inplanes, planes), jnp.float32)
                sd, bd = bn_fold(planes)
                wd = wd * sd[None, :]
                W1 = (jnp.zeros((kw, cin_p, 2 * cout_p), jnp.float32)
                      .at[:, :inplanes, :planes].set(w1)
                      .at[kw // 2, :inplanes, cout_p:cout_p + planes].set(wd)
                      .reshape(kw * cin_p, 2 * cout_p).astype(jnp.bfloat16))
                B1 = (jnp.zeros((2 * cout_p,), jnp.float32)
                      .at[:planes].set(b1)
                      .at[cout_p:cout_p + planes].set(bd))
            else:
                W1 = (jnp.zeros((kw, cin_p, cout_p), jnp.float32)
                      .at[:, :inplanes, :planes].set(w1)
                      .reshape(kw * cin_p, cout_p).astype(jnp.bfloat16))
                B1 = jnp.zeros((cout_p,), jnp.float32).at[:planes].set(b1)

            blocks.append({"kw": kw, "stride": stride, "has_down": has_down,
                           "w1": W1, "b1": B1, "w2": W2, "b2": B2,
                           "cout": planes, "cout_pad": cout_p})
            inplanes = planes
        blocks_all.append(blocks)
    params["layers"] = blocks_all
    return params


# --------------------------------------------------------------------------------------
# SpeechBasicBlock: conv1+bn1+relu (+fused downsample) -> conv2+bn2 (+fused residual add)
# (no ReLU after the residual add — matches the reference module)
# --------------------------------------------------------------------------------------
def basic_block(x_btc, p):
    kw, stride, cout_p = p["kw"], p["stride"], p["cout_pad"]
    if p["has_down"]:
        h2 = conv1d_bn(x_btc, p["w1"], p["b1"], kw=kw, stride=stride, relu_cols=cout_p)
        h, res = h2[..., :cout_p], h2[..., cout_p:]   # second half = downsample residual
    else:
        h = conv1d_bn(x_btc, p["w1"], p["b1"], kw=kw, stride=stride, relu_cols=cout_p)
        res = x_btc                                   # identity residual
    return conv1d_bn(h, p["w2"], p["b2"], kw=kw, stride=1, relu_cols=0, residual=res)


# --------------------------------------------------------------------------------------
# ResDavenetVQ.forward (nframes=None, all VQ layers disabled)
# --------------------------------------------------------------------------------------
def resdavenet_vq_forward(params, x):
    """x: (B, feat_dim, T) f32 -> (x_out NCHW f32, quant_losses, flat_inputs, flat_onehots)."""
    B, F, T = x.shape
    stem = params["stem"]
    quant_losses, flat_inputs, flat_onehots = [None] * 5, [None] * 5, [None] * 5

    xb = jnp.transpose(x, (0, 2, 1))                               # (B, T, F)
    xb = jnp.pad(xb, ((0, 0), (0, 0), (0, stem["feat_pad"] - F))).astype(jnp.bfloat16)

    # stem: conv1 (kernel (F,1)) == per-frame matmul over features, + bn1 + relu
    h = conv1d_bn(xb, stem["w"], stem["b"], kw=1, stride=1, relu_cols=stem["cout_pad"])
    flat_inputs[0] = h[..., :stem["cout"]].reshape(-1, stem["cout"]).astype(jnp.float32)

    cur = h
    for li in range(4):
        for blk in params["layers"][li]:
            cur = basic_block(cur, blk)
        c = params["layers"][li][-1]["cout"]
        flat_inputs[li + 1] = cur[..., :c].reshape(-1, c).astype(jnp.float32)

    c_last = params["layers"][3][-1]["cout"]
    x_out = jnp.transpose(cur[..., :c_last], (0, 2, 1))[:, :, None, :].astype(jnp.float32)
    return x_out, quant_losses, flat_inputs, flat_onehots


# --------------------------------------------------------------------------------------
if __name__ == "__main__":
    # small config consistent with the module's __init__
    feat_dim = 8
    layer_widths = [16, 16, 32, 64, 128]
    layers = [2, 2, 2, 2]
    convsize = 9
    B, T = 2, 32

    key = jax.random.PRNGKey(0)
    k_param, k_x = jax.random.split(key)
    params = init_params(k_param, feat_dim, layer_widths, layers, convsize)
    x = jax.random.normal(k_x, (B, feat_dim, T), jnp.float32)

    x_out, quant_losses, flat_inputs, flat_onehots = resdavenet_vq_forward(params, x)

    jax.block_until_ready(x_out)
    for fi in flat_inputs:
        jax.block_until_ready(fi)

    # sanity: shapes implied by the PyTorch forward
    assert x_out.shape == (B, layer_widths[4], 1, T // 16)
    assert x_out.dtype == jnp.float32
    assert all(l is None for l in quant_losses)
    assert all(o is None for o in flat_onehots)
    assert flat_inputs[0].shape == (B * T, layer_widths[0])
    assert flat_inputs[4].shape == (B * (T // 16), layer_widths[4])
    assert bool(jnp.all(jnp.isfinite(x_out)))

    print("KERNEL_OK")
</pallas_src>

<mosaic_0001>
module attributes {stable_mosaic.version = 11 : i64} {
  func.func @_conv_bn_kernel(%arg0: i32, %arg1: i32, %arg2: memref<1x32x128xbf16, #tpu.memory_space<vmem>>, %arg3: memref<128x128xbf16, #tpu.memory_space<vmem>>, %arg4: memref<1x128xf32, #tpu.memory_space<vmem>>, %arg5: memref<1x32x128xbf16, #tpu.memory_space<vmem>>) attributes {dimension_semantics = [#tpu.dimension_semantics<parallel>, #tpu.dimension_semantics<parallel>], iteration_bounds = array<i64: 2, 1>, scalar_prefetch = 0 : i64, scratch_operands = 0 : i64, tpu.core_type = #tpu.core_type<tc>, window_params = [{transform_indices = @transform_0, window_bounds = array<i64: 1, 32, 128>}, {pipeline_mode = #tpu.pipeline_mode<synchronous>, transform_indices = @transform_1, window_bounds = array<i64: 128, 128>}, {pipeline_mode = #tpu.pipeline_mode<synchronous>, transform_indices = @transform_2, window_bounds = array<i64: 1, 128>}, {transform_indices = @transform_3, window_bounds = array<i64: 1, 32, 128>}]} {
    %c32_i32 = arith.constant 32 : i32
    %0 = arith.muli %arg1, %c32_i32 : i32
    %1 = tpu.assume_multiple %0, 32 : i32
    %cst = arith.constant 0.000000e+00 : f32
    %2 = vector.broadcast %cst : f32 to vector<32x128xf32>
    %c0_i32 = arith.constant 0 : i32
    %3 = arith.addi %1, %c0_i32 : i32
    %c0 = arith.constant 0 : index
    %4 = arith.index_cast %3 : i32 to index
    %c0_0 = arith.constant 0 : index
    %5 = vector.load %arg2[%c0, %4, %c0_0] : memref<1x32x128xbf16, #tpu.memory_space<vmem>>, vector<1x32x128xbf16>
    %6 = vector.shape_cast %5 : vector<1x32x128xbf16> to vector<32x128xbf16>
    %c0_1 = arith.constant 0 : index
    %c0_2 = arith.constant 0 : index
    %7 = vector.load %arg3[%c0_1, %c0_2] : memref<128x128xbf16, #tpu.memory_space<vmem>>, vector<128x128xbf16>
    %cst_3 = arith.constant dense<0.000000e+00> : vector<32x128xf32>
    %8 = tpu.matmul %6, %7, %cst_3 {dimension_numbers = #tpu.dot_dimension_numbers<[1], [0], [0], [1], [0, 0, 1, 1], [], []>} : vector<32x128xbf16>, vector<128x128xbf16>, vector<32x128xf32> -> vector<32x128xf32>
    %9 = arith.addf %2, %8 : vector<32x128xf32>
    %c0_4 = arith.constant 0 : index
    %c0_5 = arith.constant 0 : index
    %10 = vector.load %arg4[%c0_4, %c0_5] : memref<1x128xf32, #tpu.memory_space<vmem>>, vector<1x128xf32>
    %11 = vector.broadcast %10 : vector<1x128xf32> to vector<32x128xf32>
    %12 = arith.addf %9, %11 : vector<32x128xf32>
    %cst_6 = arith.constant 0.000000e+00 : f32
    %13 = vector.broadcast %cst_6 : f32 to vector<32x128xf32>
    %14 = arith.maximumf %12, %13 : vector<32x128xf32>
    %15 = arith.truncf %14 : vector<32x128xf32> to vector<32x128xbf16>
    %c0_7 = arith.constant 0 : index
    %c0_8 = arith.constant 0 : index
    %c0_9 = arith.constant 0 : index
    %16 = vector.load %arg5[%c0_7, %c0_8, %c0_9] : memref<1x32x128xbf16, #tpu.memory_space<vmem>>, vector<1x32x128xbf16>
    %17 = vector.shape_cast %16 : vector<1x32x128xbf16> to vector<32x128xbf16>
    %18 = vector.shape_cast %15 : vector<32x128xbf16> to vector<1x32x128xbf16>
    tpu.vector_store %arg5[%c0_7, %c0_8, %c0_9], %18 {strides = array<i32>} : memref<1x32x128xbf16, #tpu.memory_space<vmem>>, vector<1x32x128xbf16>,
    return
  }
  func.func @transform_0(%arg0: i32, %arg1: i32) -> (i32, i32, i32) {
    %c0_i32 = arith.constant 0 : i32
    %c0_i32_0 = arith.constant 0 : i32
    %c0_i32_1 = arith.constant 0 : i32
    return %arg0, %c0_i32, %c0_i32_0 : i32, i32, i32
  }
  func.func @transform_1(%arg0: i32, %arg1: i32) -> (i32, i32) {
    %c0_i32 = arith.constant 0 : i32
    %c0_i32_0 = arith.constant 0 : i32
    %c0_i32_1 = arith.constant 0 : i32
    return %c0_i32, %c0_i32_0 : i32, i32
  }
  func.func @transform_2(%arg0: i32, %arg1: i32) -> (i32, i32) {
    %c0_i32 = arith.constant 0 : i32
    %c0_i32_0 = arith.constant 0 : i32
    %c0_i32_1 = arith.constant 0 : i32
    return %c0_i32, %c0_i32_0 : i32, i32
  }
  func.func @transform_3(%arg0: i32, %arg1: i32) -> (i32, i32, i32) {
    %c0_i32 = arith.constant 0 : i32
    %c0_i32_0 = arith.constant 0 : i32
    return %arg0, %arg1, %c0_i32 : i32, i32, i32
  }
}

</mosaic_0001>

<bundles_post_ra>
// kernel: tpu_custom_call.1
= control target key start
LH: loop header
LB: loop body
LE: loop exit
PB: predicated region body
PF: predicated region fallthrough
CT: control target
= control target key end

     0   :  { %s958_s0 = inlined_call_operand.hbm [shape: bf16[2,32,128], index: 0, kind: input, shape index: {}]   ;;  %s959_s1 = inlined_call_operand.hbm [shape: bf16[128,128], index: 1, kind: input, shape index: {}]   ;;  %s960_s2 = inlined_call_operand.vmem [shape: f32[1,128], index: 2, kind: input, shape index: {}]   ;;  %s961_s3 = inlined_call_operand.hbm [shape: bf16[2,32,128], index: 3, kind: output, shape index: {}]  }
   0x1   :  { %963 = sst [smem:[#allocation11_spill]] %s959_s1 }
   0x2   :  { %8 = vsyncpa [#allocation3], 0 }
   0x3   :  { %10 = vsyncpa [#allocation3 + $0x1], 0 }
   0x4   :  { %11 = vsyncpa [#allocation6], 0 }
   0x5   :  { %12 = vsyncpa [#allocation4], 0 }
   0x6   :  { %14 = vsyncpa [#allocation4 + $0x1], 0  ;;  %s796_s12 = smov 0   ;;  %s798_s13 = smov 0  }
   0x7   :  { %s800_s14 = smov 0   ;;  %s802_s15 = smov 0  }
   0x8   :  { %s804_s16 = smov 0   ;;  %s806_s17 = smov 0  }
   0x9 LB: > { %s457_s18 = sadd.s32 4294967295, %s769_s17   ;;  %s458_s19 = sadd.s32 4294967294, %s769_s17   ;;  %s769_s17 = sphi %s806_s17, %s20_s17   ;;  %s765_s16 = sphi %s804_s16, %s977_s16   ;;  %s761_s15 = sphi %s802_s15, %s976_s15   ;;  %s757_s14 = sphi %s800_s14, %s975_s14   ;;  %s753_s13 = sphi %s798_s13, %s974_s13   ;;  %s749_s12 = sphi %s796_s12, %s973_s12  }
   0xa   : > { %p52_p0 = scmp.ne.s32.totalorder %s753_s13, %s749_s12  ;;  %p830_p1 = scmp.eq.s32.totalorder %s457_s18, 0 }
   0xb   : > { %p834_p2 = scmp.eq.s32.totalorder %s457_s18, 1  ;;  %p126_p3 = scmp.eq.s32.totalorder %s458_s19, 1 }
   0xc   : > { %p840_p4 = por %p830_p1, %p52_p0  ;;  %p459_p5 = scmp.ge.s32.totalorder %s769_s17, 1 }
   0xd   : > { %p845_p6 = por %p126_p3, %p52_p0  ;;  %p133_p7 = scmp.lt.s32.totalorder %s769_s17, 3 }
   0xe   : > { %s968_s1 = sld [smem:[#allocation11_spill]]  ;;  %s771_s28 = smov [#allocation5]  }
   0xf   : > { %p853_p8 = pnand %p459_p5, %p133_p7  ;;  %s146_s29 = sshll.u32 %s771_s28, 4  ;;  %s147_s29 = int_to_ptr.vmem [resolvable:$true] %s146_s29 }
  0x10   : > { %p461_p11 = scmp.ge.s32.totalorder %s769_s17, 2  ;;  %s962_s30 = smov 64  }
  0x11   : > { %p553_p9 = pneg %p853_p8  ;;  %s773_s4 = smov 4  }
  0x12   : > { %s32_s5 = sadd.s32 1, %s765_s16  ;;  %s39_s6 = sadd.s32 1, %s757_s14 }
  0x13   : > { %p554_p10 = pnand %p553_p9, %p830_p1  ;;  %p34_p12 = scmp.ge.s32.totalorder %s32_s5, 2 }
  0x14   : > { %s144_s26 = sshll.u32 %s968_s1, 4  ;;  %p46_p13 = scmp.ne.s32.totalorder %s757_s14, %s753_s13  ;;  %s145_s26 = int_to_ptr.hbm [resolvable:$true] %s144_s26 }
  0x15   : > { %556 = dma.hbm_to_vmem [thread:$0]  (!%p554_p10), %s145_s26, 1024, %s147_s29, [#allocation6], %s962_s30, %s962_s30, %s773_s4  }
  0x16   : > { %p47_p0 = scmp.eq.s32.totalorder %s769_s17, 0  ;;  %s979_s5 = smov (%p34_p12, %s32_s5), 0 }
  0x17   : > { %p878_p5 = por %p834_p2, %p46_p13  ;;  %s36_s9 = ssub.s32 %s765_s16, %s979_s5 }
  0x18   : > { %p872_p3 = por %p47_p0, %p46_p13  ;;  %p566_p7 = scmp.lt.s32.totalorder %s769_s17, 2 }
  0x19   : > { %p37_p9 = scmp.eq.s32.totalorder %s36_s9, 0  ;;  %s163_s10 = sand.u32 1, %s757_s14  }
  0x1a   : > { %s462_s11 = sshll.u32 %s163_s10, 4  ;;  %s514_s19 = sshll.u32 %s765_s16, 4 }
  0x1b   : > { %s887_s18 = scalar_select %p37_p9, %s757_s14, %s39_s6  }
  0x1c   : > { %s172_s26 = scalar_lea.hbm %s958_s0, %s514_s19  ;;  %s167_s28 = scalar_lea.vmem [#allocation2], %s462_s11 }
  0x1d   : > { %s175_s29 = sshll.u32 %s167_s28, 4  ;;  %s173_s21 = sshll.u32 %s172_s26, 4  ;;  %s176_s29 = int_to_ptr.vmem [resolvable:$true] %s175_s29  ;;  %s174_s21 = int_to_ptr.hbm [resolvable:$true] %s173_s21 }
  0x1e   : > { %p558_p2 = pnand %p566_p7, %p872_p3  ;;  %s164_s30 = scalar_lea.sflag [#allocation3], %s163_s10 }
  0x1f   : > { %s972_s1 = smov 64   ;;  %187 = sbr.rel (%p853_p8) target bundleno = 216 (0xd8), region = 32 }
  0x20   : > { %560 = dma.hbm_to_vmem [thread:$0]  (!%p558_p2), %s174_s21, 256, %s176_s29, %s164_s30, %s972_s1, %s972_s1, %s773_s4  }
  0x21   : > { %s901_s6 = sand.u32 (!%p853_p8), 1, %s753_s13  }
  0x22   : > { %s466_s9 = sshll.u32 (!%p853_p8), %s901_s6, 4  ;;  %s190_s11 = scalar_lea.sflag (!%p853_p8), [#allocation3], %s901_s6 }
  0x23   : > { %s193_s7 = scalar_lea.vmem (!%p853_p8), [#allocation2], %s466_s9 }
  0x24   : > { %736 = dma.done.wait (%p840_p4), %s190_s11, 256  }
  0x25   : > { %738 = vsyncadd (%p840_p4), %s190_s11, 4294967040 }
  0x26   : > { %740 = dma.done.wait (%p830_p1), [#allocation6], 1024  }
  0x27   : > { %742 = vsyncadd (%p830_p1), [#allocation6], 4294966272  ;;  %v524_v0 = vld [vmem:[#allocation5 + $0x38] sm:$0xff]  ;;  %v523_v1 = vld [vmem:[#allocation5 + $0x30] sm:$0xff]  ;;  %s525_s22 = sshll.u32 %s761_s15, 4  ;;  %s221_s10 = scalar_lea.vmem [#allocation7], %s466_s9 }
  0x28   : > { %312 = vmatpush.bf16.msra.mxu0 %v524_v0  ;;  %537 = vmatpush.bf16.msra.mxu1 %v524_v0  ;;  %v522_v2 = vld [vmem:[#allocation5 + $0x28] sm:$0xff]  ;;  %v521_v3 = vld [vmem:[#allocation5 + $0x20] sm:$0xff]  ;;  %v520_v4 = vld [vmem:[#allocation5 + $0x18] sm:$0xff]  ;;  %s357_s4 = scalar_lea.hbm %s961_s3, %s525_s22  ;;  %s358_s19 = sshll.u32 %s221_s10, 4  ;;  %s359_s19 = int_to_ptr.vmem [resolvable:$true] %s358_s19 }
  0x29   : > { %v519_v5 = vld [vmem:[#allocation5 + $0x10] sm:$0xff]  ;;  %v518_v6 = vld [vmem:[#allocation5 + $0x8] sm:$0xff]  ;;  %v517_v7 = vld [vmem:[#allocation5] sm:$0xff]  ;;  %s360_s24 = sshll.u32 %s357_s4, 4  ;;  %s344_s15 = scalar_lea.sflag [#allocation4], %s901_s6  ;;  %s361_s24 = int_to_ptr.hbm [resolvable:$true] %s360_s24 }
  0x2a   : > { %v515_v8 = vld [vmem:[%s193_s7] sm:$0xff]  ;;  %v516_v9 = vld [vmem:[%s193_s7 + $0x8] sm:$0xff]  ;;  %s697_s25 = sshra.s32 %s361_s24, 4  ;;  %s703_s21 = scalar_lea.hbm %s961_s3, 32  ;;  %s698_s25 = int_to_ptr.hbm [resolvable:$true] %s697_s25 }
  0x2b   : > { %v622_v12 = vld [vmem:[%s960_s2] ss:$0 sm:$0xff]  ;;  %s699_s26 = scalar_lea.hbm %s698_s25, 16  ;;  %p704_p10 = scmp.lt.s32.totalorder %s698_s25, %s961_s3 }
  0x2c   : > { %313 = vmatpush.bf16.msra.mxu0 %v523_v1  ;;  %538 = vmatpush.bf16.msra.mxu1 %v523_v1  ;;  %p700_p1 = scmp.ne.s32.totalorder %s698_s25, %s699_s26  ;;  %p705_p12 = scmp.lt.s32.totalorder %s703_s21, %s699_s26 }
  0x2e   : > { %p701_p4 = pnand %p700_p1, %p878_p5  ;;  %p706_p13 = por %p705_p12, %p704_p10 }
  0x30   : > { %314 = vmatpush.bf16.msra.mxu0 %v522_v2  ;;  %539 = vmatpush.bf16.msra.mxu1 %v522_v2  ;;  %p702_p8 = pneg %p701_p4 }
  0x32   : > { %p707_p0 = pnand %p706_p13, %p702_p8 }
  0x34   : > { %315 = vmatpush.bf16.msra.mxu0 %v521_v3  ;;  %540 = vmatpush.bf16.msra.mxu1 %v521_v3 }
  0x38   : > { %316 = vmatpush.bf16.msra.mxu0 %v520_v4  ;;  %541 = vmatpush.bf16.msra.mxu1 %v520_v4 }
  0x3c   : > { %317 = vmatpush.bf16.msra.mxu0 %v519_v5  ;;  %542 = vmatpush.bf16.msra.mxu1 %v519_v5 }
  0x40   : > { %318 = vmatpush.bf16.msra.mxu0 %v518_v6  ;;  %543 = vmatpush.bf16.msra.mxu1 %v518_v6 }
  0x44   : > { %319 = vmatpush.bf16.msra.mxu0 %v517_v7  ;;  %544 = vmatpush.bf16.msra.mxu1 %v517_v7 }
  0x47   : > { %320 = vmatmul.bf16.vlgmr.msra.gmra.mxu0 %v515_v8  ;;  %325 = vmatmul.bf16.vlgmr.msra.gmra.mxu1 %v516_v9 }
  0xc4   : > { %v321_v10 = vpop.f32.mrf.mxu0  ;;  %v326_v11 = vpop.f32.mrf.mxu1 }
  0xc5   : > { %v322_v13 = vadd.f32 %v622_v12, %v321_v10  ;;  %v327_v14 = vadd.f32 %v622_v12, %v326_v11 }
  0xc7   : > { %v331_v19 = vmax.f32 %v322_v13, 0.0  ;;  %v333_v20 = vmax.f32 %v327_v14, 0.0 }
  0xcc   : > { %v323_v15 = vpop.f32.mrf.mxu0  ;;  %v328_v16 = vpop.f32.mrf.mxu1 }
  0xcd   : > { %v324_v17 = vadd.f32 %v622_v12, %v323_v15  ;;  %v329_v18 = vadd.f32 %v622_v12, %v328_v16 }
  0xcf   : > { %v332_v21 = vmax.f32 %v324_v17, 0.0  ;;  %v334_v22 = vmax.f32 %v329_v18, 0.0 }
  0xd1   : > { %v529_v23 = vpack.c.bf16 %v332_v21, %v331_v19  ;;  %v534_v24 = vpack.c.bf16 %v334_v22, %v333_v20 }
  0xd3   : > { %530 = vst [vmem:[%s221_s10] sm:$0xff] %v529_v23  }
  0xd4   : > { %536 = vst [vmem:[%s221_s10 + $0x8] sm:$0xff] %v534_v24  }
  0xd5   : > { %710 = shalt.err (!%p707_p0)
}
  0xd6   : > { %s774_s6 = smov 64   ;;  %s775_s7 = smov 4  }
  0xd7   : > { %551 = dma.vmem_to_hbm [thread:$0]  (%p878_p5), %s359_s19, 256, %s361_s24, %s344_s15, %s774_s6, %s774_s6, %s775_s7  }
  0xd8 PF: > { %s375_s1 = sand.u32 1, %s749_s12   ;;  %p562_p3 = pnand %p461_p11, %p845_p6 }
  0xd9   : > { %s376_s20 = scalar_lea.sflag [#allocation4], %s375_s1 }
  0xda   : > { %p563_p7 = pneg %p562_p3 }
  0xdc   : > { %744 = dma.done.wait (%p563_p7), %s376_s20, 256  }
  0xdd   : > { %746 = vsyncadd (%p563_p7), %s376_s20, 4294967040  ;;  %s20_s17 = sadd.s32 1, %s769_s17   ;;  %s973_s12 = smov %s753_s13 }
  0xde   : > { %p17_p9 = scmp.ge.s32.totalorder %s20_s17, 4   ;;  %s974_s13 = smov %s757_s14 }
  0xdf   : > { %s975_s14 = smov %s887_s18  ;;  %s976_s15 = smov %s765_s16 }
  0xe0   : > { %s977_s16 = smov %s979_s5  ;;  %19 = sbr.rel (!%p17_p9) target bundleno = 9 (0x9), region = 82 }
  0xe5   :  { %382 = vsyncpa [#allocation3], 1 }
  0xe6   :  { %384 = vsyncpa [#allocation3 + $0x1], 1 }
  0xe7   :  { %385 = vsyncpa [#allocation6], 1 }
  0xe8   :  { %386 = vsyncpa [#allocation4], 1 }
  0xe9   :  { %388 = vsyncpa [#allocation4 + $0x1], 1 }

</bundles_post_ra>
